<compile_context>
chip_gen: v7x
topology: tpu7x:2x2x1
jax: 0.10.0
libtpu: 0.0.40
codegen_flags: <defaults>
</compile_context>

<pallas_src>
import jax
import jax.numpy as jnp
from jax.experimental import pallas as pl
from jax.experimental.pallas import tpu as pltpu


def _stats_kernel(wT_ref, col_ref, s1_ref, s2_ref):
    """Pass 1: per-output-channel sum and sum-of-squares of the (bias-free) conv output.

    wT_ref:  (C2, KKC)  bf16   flattened flipped conv-transpose weight, transposed
    col_ref: (KKC, TN)  bf16   one tile of the transposed im2col slab
    s1_ref:  (C2, 1)    f32    running per-channel sum (resident across the grid)
    s2_ref:  (C2, 1)    f32    running per-channel sum of squares
    """
    t = pl.program_id(0)

    @pl.when(t == 0)
    def _init():
        s1_ref[...] = jnp.zeros_like(s1_ref)
        s2_ref[...] = jnp.zeros_like(s2_ref)

    # (C2, KKC) @ (KKC, TN) -> (C2, TN); bf16 operands, f32 accumulate on the MXU.
    acc = jnp.dot(wT_ref[...], col_ref[...], preferred_element_type=jnp.float32)
    s1_ref[...] += jnp.sum(acc, axis=1, keepdims=True)
    s2_ref[...] += jnp.sum(acc * acc, axis=1, keepdims=True)


def _norm_glu_kernel(wT_ref, scale_ref, shift_ref, col_ref, out_ref):
    """Pass 2: recompute the conv tile, apply the folded BN affine, GLU.

    Output is lane-dense: (C, TN) with TN a multiple of 128.
    """
    acc = jnp.dot(wT_ref[...], col_ref[...], preferred_element_type=jnp.float32)
    y = acc * scale_ref[...] + shift_ref[...]          # folded BN: 2 VPU ops/elem
    c = out_ref.shape[0]
    x1 = y[:c, :]
    x2 = y[c:, :]
    # sigmoid via EUP exp + approx reciprocal (keeps the divide off the VPU).
    out_ref[...] = x1 * pl.reciprocal(1.0 + jnp.exp(-x2), approx=True)


@jax.jit
def input_block_forward(x_nchw, w_t, bias, gamma, beta):
    """Forward pass of InputBlock.

    x_nchw: (B, Cin, H, W)
    w_t:    (Cin, C2, K, K)   PyTorch ConvTranspose2d weight layout
    bias:   (C2,)             conv bias (mathematically cancels under train-mode BN)
    gamma:  (C2,)             BatchNorm weight
    beta:   (C2,)             BatchNorm bias
    returns (B, C2 // 2, H + K - 1, W + K - 1) in NCHW
    """
    del bias  # per-channel conv bias cancels exactly under train-mode BatchNorm

    B, Cin, H, W = x_nchw.shape
    _, C2, K, _ = w_t.shape
    Ho, Wo = H + K - 1, W + K - 1
    C = C2 // 2
    N = B * Ho * Wo
    KKC = K * K * Cin

    # --- glue: transposed im2col (KKC, N) of the zero-padded input; ConvTranspose2d
    # == full-padded correlation with flipped kernel and swapped in/out channels ---
    x_nhwc = jnp.transpose(x_nchw, (0, 2, 3, 1)).astype(jnp.float32)
    xp = jnp.pad(x_nhwc, ((0, 0), (K - 1, K - 1), (K - 1, K - 1), (0, 0)))
    patches = [xp[:, kh:kh + Ho, kw:kw + Wo, :] for kh in range(K) for kw in range(K)]
    colT = jnp.transpose(jnp.stack(patches, axis=0), (0, 4, 1, 2, 3)).reshape(KKC, N)

    # Tile the N (lane) axis. Zero-padded columns contribute exactly 0 to the
    # bias-free sums; BN stats are divided by the true N below.
    TN = min(512, pl.cdiv(N, 128) * 128)
    nt = pl.cdiv(N, TN)
    Np = nt * TN
    colT = jnp.pad(colT, ((0, 0), (0, Np - N))).astype(jnp.bfloat16)
    # TODO(synk): patch extraction could move in-kernel (shifted-window BlockSpecs) to
    # avoid materializing the K*K-duplicated im2col slab in HBM; bf16 halves it for now.

    # wT[oc, (kh*K+kw)*Cin + ic] = w_t[ic, oc, K-1-kh, K-1-kw]
    wT = jnp.transpose(w_t[:, :, ::-1, ::-1], (1, 2, 3, 0)).reshape(C2, KKC)
    wT = wT.astype(jnp.bfloat16)

    # ---- pass 1: per-channel sum / sum-of-squares (reduction over column tiles) ----
    s1, s2 = pl.pallas_call(
        _stats_kernel,
        out_shape=(jax.ShapeDtypeStruct((C2, 1), jnp.float32),
                   jax.ShapeDtypeStruct((C2, 1), jnp.float32)),
        grid=(nt,),
        in_specs=[
            pl.BlockSpec((C2, KKC), lambda t: (0, 0)),   # weight stays resident
            pl.BlockSpec((KKC, TN), lambda t: (0, t)),   # stream im2col tiles
        ],
        out_specs=[
            pl.BlockSpec((C2, 1), lambda t: (0, 0)),     # resident accumulators
            pl.BlockSpec((C2, 1), lambda t: (0, 0)),
        ],
        compiler_params=pltpu.CompilerParams(dimension_semantics=("arbitrary",)),
    )(wT, colT)

    # Tiny glue: fold train-mode BN (biased var, eps=1e-5) into per-channel scale/shift.
    mean = s1[:, 0] / N
    var = jnp.maximum(s2[:, 0] / N - mean * mean, 0.0)
    scale = gamma.astype(jnp.float32) * jax.lax.rsqrt(var + 1e-5)
    shift = beta.astype(jnp.float32) - mean * scale

    # ---- pass 2: normalize + GLU, lane-dense (C, Np) output, parallel over tiles ----
    outT = pl.pallas_call(
        _norm_glu_kernel,
        out_shape=jax.ShapeDtypeStruct((C, Np), jnp.float32),
        grid=(nt,),
        in_specs=[
            pl.BlockSpec((C2, KKC), lambda t: (0, 0)),
            pl.BlockSpec((C2, 1), lambda t: (0, 0)),
            pl.BlockSpec((C2, 1), lambda t: (0, 0)),
            pl.BlockSpec((KKC, TN), lambda t: (0, t)),
        ],
        out_specs=pl.BlockSpec((C, TN), lambda t: (0, t)),
        compiler_params=pltpu.CompilerParams(dimension_semantics=("parallel",)),
    )(wT, scale.reshape(C2, 1), shift.reshape(C2, 1), colT)

    # (C, N) -> (B, C, Ho, Wo)
    return jnp.transpose(outT[:, :N].reshape(C, B, Ho, Wo), (1, 0, 2, 3))


def _reference_forward(x, w_t, bias, gamma, beta):
    """Pure-JAX reference matching PyTorch InputBlock semantics (training-mode BN)."""
    B, Cin, H, W = x.shape
    _, C2, K, _ = w_t.shape
    Ho, Wo = H + K - 1, W + K - 1
    out = jnp.zeros((B, C2, Ho, Wo), jnp.float32)
    for kh in range(K):
        for kw in range(K):
            contrib = jnp.einsum('bchw,cd->bdhw', x, w_t[:, :, kh, kw])
            out = out.at[:, :, kh:kh + H, kw:kw + W].add(contrib)
    out = out + bias[None, :, None, None]
    mean = out.mean(axis=(0, 2, 3), keepdims=True)
    var = out.var(axis=(0, 2, 3), keepdims=True)  # biased (ddof=0), as in PyTorch BN fwd
    y = (out - mean) / jnp.sqrt(var + 1e-5) * gamma[None, :, None, None] + beta[None, :, None, None]
    c = C2 // 2
    return y[:, :c] * jax.nn.sigmoid(y[:, c:])


if __name__ == "__main__":
    # batch=2, in_channels=4, out_channels=8 (-> conv emits 16 ch), spatial 16x16
    # -> conv-transpose output 19x19 -> GLU output (2, 8, 19, 19).
    B, Cin, Cout, H, W, K = 2, 4, 8, 16, 16, 4
    C2 = Cout * 2

    key = jax.random.PRNGKey(0)
    k_x, k_w, k_b, k_g, k_be = jax.random.split(key, 5)
    x = jax.random.normal(k_x, (B, Cin, H, W), dtype=jnp.float32)
    # ConvTranspose2d weight layout: (in_channels, out_channels, kH, kW)
    w_t = 0.1 * jax.random.normal(k_w, (Cin, C2, K, K), dtype=jnp.float32)
    bias = 0.1 * jax.random.normal(k_b, (C2,), dtype=jnp.float32)
    gamma = 1.0 + 0.1 * jax.random.normal(k_g, (C2,), dtype=jnp.float32)
    beta = 0.1 * jax.random.normal(k_be, (C2,), dtype=jnp.float32)

    # The kernel feeds the MXU bf16 operands; round test inputs to the bf16 grid so the
    # f32 reference (same values) can be compared at a tight tolerance.
    x = x.astype(jnp.bfloat16).astype(jnp.float32)
    w_t = w_t.astype(jnp.bfloat16).astype(jnp.float32)

    out = jax.block_until_ready(input_block_forward(x, w_t, bias, gamma, beta))
    ref = _reference_forward(x, w_t, bias, gamma, beta)

    assert out.shape == (B, Cout, H + K - 1, W + K - 1), out.shape
    max_err = float(jnp.max(jnp.abs(out - ref)))
    assert jnp.allclose(out, ref, rtol=1e-2, atol=1e-2), max_err

    print("KERNEL_OK")
</pallas_src>

<mosaic_0001>
module attributes {stable_mosaic.version = 11 : i64} {
  func.func @_stats_kernel(%arg0: i32, %arg1: memref<16x64xbf16, #tpu.memory_space<vmem>>, %arg2: memref<64x512xbf16, #tpu.memory_space<vmem>>, %arg3: memref<16x1xf32, #tpu.memory_space<vmem>>, %arg4: memref<16x1xf32, #tpu.memory_space<vmem>>) attributes {dimension_semantics = [#tpu.dimension_semantics<arbitrary>], iteration_bounds = array<i64: 2>, scalar_prefetch = 0 : i64, scratch_operands = 0 : i64, tpu.core_type = #tpu.core_type<tc>, window_params = [{pipeline_mode = #tpu.pipeline_mode<synchronous>, transform_indices = @transform_0, window_bounds = array<i64: 16, 64>}, {transform_indices = @transform_1, window_bounds = array<i64: 64, 512>}, {pipeline_mode = #tpu.pipeline_mode<synchronous>, transform_indices = @transform_2, window_bounds = array<i64: 16, 1>}, {pipeline_mode = #tpu.pipeline_mode<synchronous>, transform_indices = @transform_3, window_bounds = array<i64: 16, 1>}]} {
    %c0_i32 = arith.constant 0 : i32
    %0 = arith.cmpi eq, %arg0, %c0_i32 : i32
    %1 = arith.extui %0 : i1 to i32
    %c0_i32_0 = arith.constant 0 : i32
    %2 = arith.cmpi ne, %1, %c0_i32_0 : i32
    scf.if %2 {
      %cst_14 = arith.constant 0.000000e+00 : f32
      %17 = vector.broadcast %cst_14 : f32 to vector<16x1xf32>
      %c0_15 = arith.constant 0 : index
      %c0_16 = arith.constant 0 : index
      %18 = vector.load %arg3[%c0_15, %c0_16] : memref<16x1xf32, #tpu.memory_space<vmem>>, vector<16x1xf32>
      tpu.vector_store %arg3[%c0_15, %c0_16], %17 {strides = array<i32>} : memref<16x1xf32, #tpu.memory_space<vmem>>, vector<16x1xf32>,
      %cst_17 = arith.constant 0.000000e+00 : f32
      %19 = vector.broadcast %cst_17 : f32 to vector<16x1xf32>
      %c0_18 = arith.constant 0 : index
      %c0_19 = arith.constant 0 : index
      %20 = vector.load %arg4[%c0_18, %c0_19] : memref<16x1xf32, #tpu.memory_space<vmem>>, vector<16x1xf32>
      tpu.vector_store %arg4[%c0_18, %c0_19], %19 {strides = array<i32>} : memref<16x1xf32, #tpu.memory_space<vmem>>, vector<16x1xf32>,
    } else {
    }
    %c0 = arith.constant 0 : index
    %c0_1 = arith.constant 0 : index
    %3 = vector.load %arg1[%c0, %c0_1] : memref<16x64xbf16, #tpu.memory_space<vmem>>, vector<16x64xbf16>
    %c0_2 = arith.constant 0 : index
    %c0_3 = arith.constant 0 : index
    %4 = vector.load %arg2[%c0_2, %c0_3] : memref<64x512xbf16, #tpu.memory_space<vmem>>, vector<64x512xbf16>
    %cst = arith.constant dense<0.000000e+00> : vector<16x512xf32>
    %5 = tpu.matmul %3, %4, %cst {dimension_numbers = #tpu.dot_dimension_numbers<[1], [0], [0], [1], [0, 0, 1, 1], [], []>} : vector<16x64xbf16>, vector<64x512xbf16>, vector<16x512xf32> -> vector<16x512xf32>
    %c0_4 = arith.constant 0 : index
    %c0_5 = arith.constant 0 : index
    %6 = vector.load %arg3[%c0_4, %c0_5] : memref<16x1xf32, #tpu.memory_space<vmem>>, vector<16x1xf32>
    %cst_6 = arith.constant dense<0.000000e+00> : vector<16xf32>
    %7 = vector.multi_reduction <add>, %5, %cst_6 [1] : vector<16x512xf32> to vector<16xf32>
    %8 = vector.shape_cast %7 : vector<16xf32> to vector<16x1xf32>
    %9 = arith.addf %6, %8 : vector<16x1xf32>
    %c0_7 = arith.constant 0 : index
    %c0_8 = arith.constant 0 : index
    %10 = vector.load %arg3[%c0_7, %c0_8] : memref<16x1xf32, #tpu.memory_space<vmem>>, vector<16x1xf32>
    tpu.vector_store %arg3[%c0_7, %c0_8], %9 {strides = array<i32>} : memref<16x1xf32, #tpu.memory_space<vmem>>, vector<16x1xf32>,
    %c0_9 = arith.constant 0 : index
    %c0_10 = arith.constant 0 : index
    %11 = vector.load %arg4[%c0_9, %c0_10] : memref<16x1xf32, #tpu.memory_space<vmem>>, vector<16x1xf32>
    %12 = arith.mulf %5, %5 : vector<16x512xf32>
    %cst_11 = arith.constant dense<0.000000e+00> : vector<16xf32>
    %13 = vector.multi_reduction <add>, %12, %cst_11 [1] : vector<16x512xf32> to vector<16xf32>
    %14 = vector.shape_cast %13 : vector<16xf32> to vector<16x1xf32>
    %15 = arith.addf %11, %14 : vector<16x1xf32>
    %c0_12 = arith.constant 0 : index
    %c0_13 = arith.constant 0 : index
    %16 = vector.load %arg4[%c0_12, %c0_13] : memref<16x1xf32, #tpu.memory_space<vmem>>, vector<16x1xf32>
    tpu.vector_store %arg4[%c0_12, %c0_13], %15 {strides = array<i32>} : memref<16x1xf32, #tpu.memory_space<vmem>>, vector<16x1xf32>,
    return
  }
  func.func @transform_0(%arg0: i32) -> (i32, i32) {
    %c0_i32 = arith.constant 0 : i32
    %c0_i32_0 = arith.constant 0 : i32
    %c0_i32_1 = arith.constant 0 : i32
    return %c0_i32, %c0_i32_0 : i32, i32
  }
  func.func @transform_1(%arg0: i32) -> (i32, i32) {
    %c0_i32 = arith.constant 0 : i32
    %c0_i32_0 = arith.constant 0 : i32
    return %c0_i32, %arg0 : i32, i32
  }
  func.func @transform_2(%arg0: i32) -> (i32, i32) {
    %c0_i32 = arith.constant 0 : i32
    %c0_i32_0 = arith.constant 0 : i32
    %c0_i32_1 = arith.constant 0 : i32
    return %c0_i32, %c0_i32_0 : i32, i32
  }
  func.func @transform_3(%arg0: i32) -> (i32, i32) {
    %c0_i32 = arith.constant 0 : i32
    %c0_i32_0 = arith.constant 0 : i32
    %c0_i32_1 = arith.constant 0 : i32
    return %c0_i32, %c0_i32_0 : i32, i32
  }
}

module attributes {stable_mosaic.version = 11 : i64} {
  func.func @_norm_glu_kernel(%arg0: i32, %arg1: memref<16x64xbf16, #tpu.memory_space<vmem>>, %arg2: memref<16x1xf32, #tpu.memory_space<vmem>>, %arg3: memref<16x1xf32, #tpu.memory_space<vmem>>, %arg4: memref<64x512xbf16, #tpu.memory_space<vmem>>, %arg5: memref<8x512xf32, #tpu.memory_space<vmem>>) attributes {dimension_semantics = [#tpu.dimension_semantics<parallel>], iteration_bounds = array<i64: 2>, scalar_prefetch = 0 : i64, scratch_operands = 0 : i64, tpu.core_type = #tpu.core_type<tc>, window_params = [{pipeline_mode = #tpu.pipeline_mode<synchronous>, transform_indices = @transform_0, window_bounds = array<i64: 16, 64>}, {pipeline_mode = #tpu.pipeline_mode<synchronous>, transform_indices = @transform_1, window_bounds = array<i64: 16, 1>}, {pipeline_mode = #tpu.pipeline_mode<synchronous>, transform_indices = @transform_2, window_bounds = array<i64: 16, 1>}, {transform_indices = @transform_3, window_bounds = array<i64: 64, 512>}, {transform_indices = @transform_4, window_bounds = array<i64: 8, 512>}]} {
    %c0 = arith.constant 0 : index
    %c0_0 = arith.constant 0 : index
    %0 = vector.load %arg1[%c0, %c0_0] : memref<16x64xbf16, #tpu.memory_space<vmem>>, vector<16x64xbf16>
    %c0_1 = arith.constant 0 : index
    %c0_2 = arith.constant 0 : index
    %1 = vector.load %arg4[%c0_1, %c0_2] : memref<64x512xbf16, #tpu.memory_space<vmem>>, vector<64x512xbf16>
    %cst = arith.constant dense<0.000000e+00> : vector<16x512xf32>
    %2 = tpu.matmul %0, %1, %cst {dimension_numbers = #tpu.dot_dimension_numbers<[1], [0], [0], [1], [0, 0, 1, 1], [], []>} : vector<16x64xbf16>, vector<64x512xbf16>, vector<16x512xf32> -> vector<16x512xf32>
    %c0_3 = arith.constant 0 : index
    %c0_4 = arith.constant 0 : index
    %3 = vector.load %arg2[%c0_3, %c0_4] : memref<16x1xf32, #tpu.memory_space<vmem>>, vector<16x1xf32>
    %4 = vector.broadcast %3 : vector<16x1xf32> to vector<16x512xf32>
    %5 = arith.mulf %2, %4 : vector<16x512xf32>
    %c0_5 = arith.constant 0 : index
    %c0_6 = arith.constant 0 : index
    %6 = vector.load %arg3[%c0_5, %c0_6] : memref<16x1xf32, #tpu.memory_space<vmem>>, vector<16x1xf32>
    %7 = vector.broadcast %6 : vector<16x1xf32> to vector<16x512xf32>
    %8 = arith.addf %5, %7 : vector<16x512xf32>
    %9 = vector.extract_strided_slice %8 {offsets = [0, 0], sizes = [8, 512], strides = [1, 1]} : vector<16x512xf32> to vector<8x512xf32>
    %10 = vector.extract_strided_slice %8 {offsets = [8, 0], sizes = [8, 512], strides = [1, 1]} : vector<16x512xf32> to vector<8x512xf32>
    %cst_7 = arith.constant 0.000000e+00 : f32
    %11 = vector.broadcast %cst_7 : f32 to vector<8x512xf32>
    %12 = arith.subf %11, %10 : vector<8x512xf32>
    %13 = math.exp %12 : vector<8x512xf32>
    %cst_8 = arith.constant 1.000000e+00 : f32
    %14 = vector.broadcast %cst_8 : f32 to vector<8x512xf32>
    %15 = arith.addf %14, %13 : vector<8x512xf32>
    %16 = tpu.reciprocal %15 {approx = true} : vector<8x512xf32> -> vector<8x512xf32>
    %17 = arith.mulf %9, %16 : vector<8x512xf32>
    %c0_9 = arith.constant 0 : index
    %c0_10 = arith.constant 0 : index
    %18 = vector.load %arg5[%c0_9, %c0_10] : memref<8x512xf32, #tpu.memory_space<vmem>>, vector<8x512xf32>
    tpu.vector_store %arg5[%c0_9, %c0_10], %17 {strides = array<i32>} : memref<8x512xf32, #tpu.memory_space<vmem>>, vector<8x512xf32>,
    return
  }
  func.func @transform_0(%arg0: i32) -> (i32, i32) {
    %c0_i32 = arith.constant 0 : i32
    %c0_i32_0 = arith.constant 0 : i32
    %c0_i32_1 = arith.constant 0 : i32
    return %c0_i32, %c0_i32_0 : i32, i32
  }
  func.func @transform_1(%arg0: i32) -> (i32, i32) {
    %c0_i32 = arith.constant 0 : i32
    %c0_i32_0 = arith.constant 0 : i32
    %c0_i32_1 = arith.constant 0 : i32
    return %c0_i32, %c0_i32_0 : i32, i32
  }
  func.func @transform_2(%arg0: i32) -> (i32, i32) {
    %c0_i32 = arith.constant 0 : i32
    %c0_i32_0 = arith.constant 0 : i32
    %c0_i32_1 = arith.constant 0 : i32
    return %c0_i32, %c0_i32_0 : i32, i32
  }
  func.func @transform_3(%arg0: i32) -> (i32, i32) {
    %c0_i32 = arith.constant 0 : i32
    %c0_i32_0 = arith.constant 0 : i32
    return %c0_i32, %arg0 : i32, i32
  }
  func.func @transform_4(%arg0: i32) -> (i32, i32) {
    %c0_i32 = arith.constant 0 : i32
    %c0_i32_0 = arith.constant 0 : i32
    return %c0_i32, %arg0 : i32, i32
  }
}

</mosaic_0001>

<bundles_post_ra>
// kernel: input_block_forward.2
= control target key start
LH: loop header
LB: loop body
LE: loop exit
PB: predicated region body
PF: predicated region fallthrough
CT: control target
= control target key end

     0   :  { %s617_s12 = smov 0   ;;  %s619_s13 = smov 0   ;;  %s741_s0 = inlined_call_operand.vmem [shape: bf16[16,64], index: 0, kind: input, shape index: {}]   ;;  %s742_s1 = inlined_call_operand.vmem [shape: bf16[64,1024], index: 1, kind: input, shape index: {}]   ;;  %s743_s2 = inlined_call_operand.vmem [shape: f32[16,1], index: 2, kind: output, shape index: {0}]   ;;  %s744_s3 = inlined_call_operand.vmem [shape: f32[16,1], index: 3, kind: output, shape index: {1}]  }
   0x1   :  { %s621_s14 = smov 0  }
   0x2 LB: > { %s489_s15 = sadd.s32 4294967295, %s593_s14   ;;  %s634_s16 = sadd.s32 1, %s593_s14   ;;  %s593_s14 = sphi %s621_s14, %s747_s14   ;;  %s589_s13 = sphi %s619_s13, %s746_s13   ;;  %s585_s12 = sphi %s617_s12, %s745_s12  }
   0x3   : > { %s39_s17 = ssub.s32 %s593_s14, %s634_s16  ;;  %s42_s18 = sadd.s32 1, %s589_s13 }
   0x4   : > { %p40_p0 = scmp.eq.s32.totalorder %s39_s17, 0  ;;  %p49_p1 = scmp.ne.s32.totalorder %s589_s13, %s585_s12 }
   0x5   : > { %p50_p2 = scmp.eq.s32.totalorder %s593_s14, 0  ;;  %p491_p4 = scmp.ge.s32.totalorder %s593_s14, 2 }
   0x6   : > { %s643_s19 = scalar_select %p40_p0, %s589_s13, %s42_s18  }
   0x7   : > { %p51_p3 = por %p50_p2, %p49_p1  ;;  %120 = sbr.rel (%p491_p4) target bundleno = 26 (0x1a), region = 20 }
   0xe   : > { %123 = sbr.rel (!%p51_p3) target bundleno = 26 (0x1a), region = 24  ;;  %s125_s20 = sand.u32 (%p51_p3), 1, %s589_s13  }
   0xf   : > { %s519_s21 = sshll.u32 (%p51_p3), %s593_s14, 4  ;;  %s492_s22 = sshll.u32 (%p51_p3), %s125_s20, 7 }
  0x10   : > { %s651_s25 = scalar_lea.vmem (%p51_p3), %s742_s1, %s519_s21  ;;  %s127_s26 = scalar_lea.vmem (%p51_p3), [#allocation2], %s492_s22 }
  0x11   : > { %v143_v0 = vld [vmem:[%s651_s25] sm:$0xff] (%p51_p3)  ;;  %v145_v1 = vld [vmem:[%s651_s25 + $0x8] sm:$0xff] (%p51_p3) }
  0x12   : > { %v147_v2 = vld [vmem:[%s651_s25 + $0x20] sm:$0xff] (%p51_p3)  ;;  %144 = vst [vmem:[%s127_s26] sm:$0xff] (%p51_p3), %v143_v0  ;;  %146 = vst [vmem:[%s127_s26 + $0x8] sm:$0xff] (%p51_p3), %v145_v1  ;;  %v149_v3 = vld [vmem:[%s651_s25 + $0x28] sm:$0xff] (%p51_p3) }
  0x13   : > { %148 = vst [vmem:[%s127_s26 + $0x10] sm:$0xff] (%p51_p3), %v147_v2  ;;  %v151_v4 = vld [vmem:[%s651_s25 + $0x40] sm:$0xff] (%p51_p3)  ;;  %v153_v5 = vld [vmem:[%s651_s25 + $0x48] sm:$0xff] (%p51_p3)  ;;  %150 = vst [vmem:[%s127_s26 + $0x18] sm:$0xff] (%p51_p3), %v149_v3 }
  0x14   : > { %152 = vst [vmem:[%s127_s26 + $0x20] sm:$0xff] (%p51_p3), %v151_v4  ;;  %154 = vst [vmem:[%s127_s26 + $0x28] sm:$0xff] (%p51_p3), %v153_v5  ;;  %v155_v6 = vld [vmem:[%s651_s25 + $0x60] sm:$0xff] (%p51_p3)  ;;  %v157_v7 = vld [vmem:[%s651_s25 + $0x68] sm:$0xff] (%p51_p3) }
  0x15   : > { %v159_v8 = vld [vmem:[%s651_s25 + $0x80] sm:$0xff]  ;;  %156 = vst [vmem:[%s127_s26 + $0x30] sm:$0xff] %v155_v6  ;;  %158 = vst [vmem:[%s127_s26 + $0x38] sm:$0xff] %v157_v7  ;;  %v161_v9 = vld [vmem:[%s651_s25 + $0x88] sm:$0xff] }
  0x16   : > { %160 = vst [vmem:[%s127_s26 + $0x40] sm:$0xff] %v159_v8  ;;  %v163_v10 = vld [vmem:[%s651_s25 + $0xa0] sm:$0xff]  ;;  %v165_v11 = vld [vmem:[%s651_s25 + $0xa8] sm:$0xff]  ;;  %162 = vst [vmem:[%s127_s26 + $0x48] sm:$0xff] %v161_v9 }
  0x17   : > { %164 = vst [vmem:[%s127_s26 + $0x50] sm:$0xff] %v163_v10  ;;  %166 = vst [vmem:[%s127_s26 + $0x58] sm:$0xff] %v165_v11  ;;  %v167_v12 = vld [vmem:[%s651_s25 + $0xc0] sm:$0xff]  ;;  %v169_v13 = vld [vmem:[%s651_s25 + $0xc8] sm:$0xff] }
  0x18   : > { %v171_v14 = vld [vmem:[%s651_s25 + $0xe0] sm:$0xff]  ;;  %168 = vst [vmem:[%s127_s26 + $0x60] sm:$0xff] %v167_v12  ;;  %170 = vst [vmem:[%s127_s26 + $0x68] sm:$0xff] %v169_v13  ;;  %v173_v15 = vld [vmem:[%s651_s25 + $0xe8] sm:$0xff] }
  0x19   : > { %172 = vst [vmem:[%s127_s26 + $0x70] sm:$0xff] %v171_v14  ;;  %174 = vst [vmem:[%s127_s26 + $0x78] sm:$0xff] %v173_v15 }
  0x1a PF: > { %p495_p5 = scmp.ge.s32.totalorder %s593_s14, 1  ;;  %p179_p6 = scmp.lt.s32.totalorder %s593_s14, 3 }
  0x1c   : > { %p180_p7 = pnand %p495_p5, %p179_p6 }
  0x1d   : > { %s186_s27 = sand.u32 (!%p180_p7), 1, %s585_s12   ;;  %p497_p8 = scmp.ne.s32.totalorder (!%p180_p7), %s489_s15, 0 }
  0x1e   : > { %183 = sbr.rel (%p180_p7) target bundleno = 432 (0x1b0), region = 47  ;;  %s496_s28 = sshll.u32 (!%p180_p7), %s186_s27, 7 }
  0x1f   : > { %s672_s29 = scalar_lea.vmem (!%p180_p7), [#allocation2], %s496_s28 }
  0x25   : > { %209 = sbr.rel (%p497_p8) target bundleno = 44 (0x2c), region = 55  ;;  %vm210_vm0 = vcmask (!%p497_p8), 7168   ;;  %v595_v16 = vmov (!%p497_p8), 0.0  }
  0x26   : > { %211 = vst.msk [vmem:[%s743_s2] sm:$0xff] (!%p497_p8), %vm210_vm0, %v595_v16  ;;  %212 = vst.msk [vmem:[%s743_s2 + $0x8] sm:$0xff] (!%p497_p8), %vm210_vm0, %v595_v16 }
  0x27   : > { %213 = vst.msk [vmem:[%s744_s3] sm:$0xff] (!%p497_p8), %vm210_vm0, %v595_v16  ;;  %214 = vst.msk [vmem:[%s744_s3 + $0x8] sm:$0xff] (!%p497_p8), %vm210_vm0, %v595_v16 }
  0x2c PF: > { %v546_v17 = vld [vmem:[%s672_s29 + $0x4] ss:$16 sps:$4 sm:$0xff]   ;;  %v548_v18 = vld [vmem:[%s672_s29 + $0xc] ss:$16 sps:$4 sm:$0xff]   ;;  %v596_v19 = vmov 0   ;;  %vm318_vm1 = vcmask 523264  }
  0x2d   : > { %354 = vmatprep.mubr.bf16.mxu0 %v596_v19  ;;  %397 = vmatprep.mubr.bf16.mxu1 %v596_v19  ;;  %v550_v20 = vld [vmem:[%s672_s29] ss:$16 sps:$4 sm:$0xff]   ;;  %v551_v21 = vld [vmem:[%s672_s29 + $0x8] ss:$16 sps:$4 sm:$0xff]   ;;  %v552_v22 = vld [vmem:[%s672_s29 + $0x24] ss:$16 sps:$4 sm:$0xff]  }
  0x2e   : > { %322 = vmatprep.subr.bf16.mxu0 %v546_v17  ;;  %365 = vmatprep.subr.bf16.mxu1 %v548_v18  ;;  %v554_v23 = vld [vmem:[%s672_s29 + $0x2c] ss:$16 sps:$4 sm:$0xff]   ;;  %v556_v24 = vld [vmem:[%s672_s29 + $0x20] ss:$16 sps:$4 sm:$0xff]   ;;  %v557_v25 = vld [vmem:[%s672_s29 + $0x28] ss:$16 sps:$4 sm:$0xff]  }
  0x2f   : > { %323 = vmatpush1.bf16.msra.mxu0 %v550_v20  ;;  %366 = vmatpush1.bf16.msra.mxu1 %v551_v21  ;;  %v558_v26 = vld [vmem:[%s672_s29 + $0x44] ss:$16 sps:$4 sm:$0xff]   ;;  %v560_v27 = vld [vmem:[%s672_s29 + $0x4c] ss:$16 sps:$4 sm:$0xff]   ;;  %v562_v28 = vld [vmem:[%s672_s29 + $0x40] ss:$16 sps:$4 sm:$0xff]  }
  0x30   : > { %324 = vmatprep.subr.bf16.mxu0 %v552_v22  ;;  %367 = vmatprep.subr.bf16.mxu1 %v554_v23  ;;  %v563_v29 = vld [vmem:[%s672_s29 + $0x48] ss:$16 sps:$4 sm:$0xff]   ;;  %v564_v30 = vld [vmem:[%s672_s29 + $0x64] ss:$16 sps:$4 sm:$0xff]   ;;  %v566_v31 = vld [vmem:[%s672_s29 + $0x6c] ss:$16 sps:$4 sm:$0xff]  }
  0x31   : > { %v568_v32 = vld [vmem:[%s672_s29 + $0x60] ss:$16 sps:$4 sm:$0xff]   ;;  %v569_v33 = vld [vmem:[%s672_s29 + $0x68] ss:$16 sps:$4 sm:$0xff]   ;;  %vm422_vm2 = vcmask 7168  }
  0x32   : > { %v570_v34 = vld [vmem:[%s741_s0] sm:$0xff]   ;;  %v409_v5 = vld [vmem:[%s743_s2 + $0x8] sm:$0xff] }
  0x33   : > { %325 = vmatpush1.bf16.msra.mxu0 %v556_v24  ;;  %368 = vmatpush1.bf16.msra.mxu1 %v557_v25  ;;  %v408_v63 = vld [vmem:[%s743_s2] sm:$0xff]  ;;  %v426_v6 = vld [vmem:[%s744_s3 + $0x8] sm:$0xff] }
  0x34   : > { %326 = vmatprep.subr.bf16.mxu0 %v558_v26  ;;  %369 = vmatprep.subr.bf16.mxu1 %v560_v27  ;;  %v425_v0 = vld [vmem:[%s744_s3] sm:$0xff] }
  0x37   : > { %327 = vmatpush1.bf16.msra.mxu0 %v562_v28  ;;  %370 = vmatpush1.bf16.msra.mxu1 %v563_v29 }
  0x38   : > { %328 = vmatprep.subr.bf16.mxu0 %v564_v30  ;;  %371 = vmatprep.subr.bf16.mxu1 %v566_v31 }
  0x3b   : > { %329 = vmatpush1.bf16.msra.mxu0 %v568_v32  ;;  %372 = vmatpush1.bf16.msra.mxu1 %v569_v33 }
  0x3e   : > { %515 = vmatmul.mubr.msk.bf16.vlgmr.msra.gmra.mrb[0].mxu0 %vm318_vm1, %v570_v34  ;;  %516 = vmatmul.mubr.msk.bf16.vlgmr.msra.gmra.mrb[0].mxu1 %vm318_vm1, %v570_v34 }
 0x111   : > { %v356_v35 = vpop.f32.mrb[0].mxu0  ;;  %v399_v36 = vpop.f32.mrb[0].mxu1 }
 0x112   : > { %v427_v37 = vmul.f32 %v356_v35, %v356_v35  ;;  %v358_v38 = vpop.f32.mrb[1].mxu0  ;;  %v401_v39 = vpop.f32.mrb[1].mxu1  ;;  %v429_v40 = vmul.f32 %v399_v36, %v399_v36 }
 0x113   : > { %v410_v41 = vadd.f32 %v358_v38, %v356_v35  ;;  %v428_v42 = vmul.f32 %v358_v38, %v358_v38  ;;  %v360_v43 = vpop.f32.mrb[2].mxu0  ;;  %v403_v44 = vpop.f32.mrb[2].mxu1  ;;  %v430_v51 = vmul.f32 %v401_v39, %v401_v39 }
 0x114   : > { %v431_v45 = vmul.f32 %v360_v43, %v360_v43  ;;  %v362_v46 = vpop.f32.mrb[3].mxu0  ;;  %v405_v47 = vpop.f32.mrb[3].mxu1  ;;  %v433_v53 = vmul.f32 %v403_v44, %v403_v44 }
 0x115   : > { %v435_v48 = vadd.f32 %v428_v42, %v427_v37  ;;  %v415_v49 = vadd.f32 %v362_v46, %v360_v43  ;;  %v432_v50 = vmul.f32 %v362_v46, %v362_v46  ;;  %v411_v52 = vadd.f32 %v410_v41, %v399_v36 }
 0x116   : > { %v434_v59 = vmul.f32 %v405_v47, %v405_v47 }
 0x117   : > { %v440_v54 = vadd.f32 %v432_v50, %v431_v45  ;;  %v416_v55 = vadd.f32 %v415_v49, %v403_v44  ;;  %v436_v56 = vadd.f32 %v435_v48, %v429_v40  ;;  %v412_v57 = vadd.f32 %v411_v52, %v401_v39 }
 0x119   : > { %v417_v58 = vadd.f32 %v416_v55, %v405_v47  ;;  %v437_v60 = vadd.f32 %v436_v56, %v430_v51  ;;  %v441_v61 = vadd.f32 %v440_v54, %v433_v53  ;;  %413 = vadd.xlane.f32.xlu0 %v412_v57 }
 0x11b   : > { %438 = vadd.xlane.f32.xlu1 %v437_v60  ;;  %v442_v62 = vadd.f32 %v441_v61, %v434_v59 }
 0x11d   : > { %418 = vadd.xlane.f32.xlu0 %v417_v58 }
 0x11f   : > { %443 = vadd.xlane.f32.xlu1 %v442_v62 }
 0x1a6   : > { %v414_v1 = vpop.xlane.xlu0 %413 }
 0x1a7   : > { %v420_v2 = vadd.f32 %v414_v1, %v408_v63 }
 0x1a8   : > { %v439_v3 = vpop.xlane.xlu1 %438 }
 0x1a9   : > { %v445_v4 = vadd.f32 %v439_v3, %v425_v0  ;;  %423 = vst.msk [vmem:[%s743_s2] sm:$0xff] %vm422_vm2, %v420_v2 }
 0x1aa   : > { %v419_v7 = vpop.xlane.xlu0 %418 }
 0x1ab   : > { %447 = vst.msk [vmem:[%s744_s3] sm:$0xff] %vm422_vm2, %v445_v4  ;;  %v421_v8 = vadd.f32 %v419_v7, %v409_v5 }
 0x1ac   : > { %v444_v9 = vpop.xlane.xlu1 %443 }
 0x1ad   : > { %v446_v10 = vadd.f32 %v444_v9, %v426_v6  ;;  %424 = vst.msk [vmem:[%s743_s2 + $0x8] sm:$0xff] %vm422_vm2, %v421_v8 }
 0x1af   : > { %448 = vst.msk [vmem:[%s744_s3 + $0x8] sm:$0xff] %vm422_vm2, %v446_v10 }
 0x1b0 PF: > { %p11_p9 = scmp.ge.s32.totalorder %s634_s16, 4   ;;  %s745_s12 = smov %s589_s13 }
 0x1b1   : > { %s746_s13 = smov %s643_s19  ;;  %s747_s14 = smov %s634_s16 }
 0x1b2   :  { %13 = sbr.rel (!%p11_p9) target bundleno = 2 (0x2), region = 94 }

// kernel: input_block_forward.3
= control target key start
LH: loop header
LB: loop body
LE: loop exit
PB: predicated region body
PF: predicated region fallthrough
CT: control target
= control target key end

     0   :  { %s725_s15 = smov 0   ;;  %s727_s16 = smov 0   ;;  %s828_s0 = inlined_call_operand.vmem [shape: bf16[16,64], index: 0, kind: input, shape index: {}]   ;;  %s829_s1 = inlined_call_operand.vmem [shape: f32[16,1], index: 1, kind: input, shape index: {}]   ;;  %s830_s2 = inlined_call_operand.vmem [shape: f32[16,1], index: 2, kind: input, shape index: {}]   ;;  %s831_s3 = inlined_call_operand.vmem [shape: bf16[64,1024], index: 3, kind: input, shape index: {}]   ;;  %s832_s4 = inlined_call_operand.vmem [shape: f32[8,1024], index: 4, kind: output, shape index: {}]  }
   0x1   :  { %s729_s17 = smov 0  }
   0x2 LB: > { %s574_s18 = sadd.s32 4294967295, %s697_s17   ;;  %s742_s19 = sadd.s32 1, %s697_s17   ;;  %s697_s17 = sphi %s729_s17, %s835_s17   ;;  %s693_s16 = sphi %s727_s16, %s834_s16   ;;  %s689_s15 = sphi %s725_s15, %s833_s15  }
   0x3   : > { %s81_s20 = ssub.s32 %s697_s17, %s742_s19  ;;  %s84_s21 = sadd.s32 1, %s693_s16 }
   0x4   : > { %p82_p0 = scmp.eq.s32.totalorder %s81_s20, 0  ;;  %p91_p1 = scmp.ne.s32.totalorder %s693_s16, %s689_s15 }
   0x5   : > { %p92_p2 = scmp.eq.s32.totalorder %s697_s17, 0  ;;  %p577_p4 = scmp.ge.s32.totalorder %s697_s17, 2 }
   0x6   : > { %s751_s22 = scalar_select %p82_p0, %s693_s16, %s84_s21  }
   0x7   : > { %p93_p3 = por %p92_p2, %p91_p1  ;;  %152 = sbr.rel (%p577_p4) target bundleno = 26 (0x1a), region = 28 }
   0xe   : > { %155 = sbr.rel (!%p93_p3) target bundleno = 26 (0x1a), region = 32  ;;  %s157_s23 = sand.u32 (%p93_p3), 1, %s693_s16  }
   0xf   : > { %s606_s24 = sshll.u32 (%p93_p3), %s697_s17, 4  ;;  %s578_s25 = sshll.u32 (%p93_p3), %s157_s23, 7 }
  0x10   : > { %s759_s28 = scalar_lea.vmem (%p93_p3), %s831_s3, %s606_s24  ;;  %s159_s29 = scalar_lea.vmem (%p93_p3), [#allocation2], %s578_s25 }
  0x11   : > { %v175_v0 = vld [vmem:[%s759_s28] sm:$0xff] (%p93_p3)  ;;  %v177_v1 = vld [vmem:[%s759_s28 + $0x8] sm:$0xff] (%p93_p3) }
  0x12   : > { %v179_v2 = vld [vmem:[%s759_s28 + $0x20] sm:$0xff] (%p93_p3)  ;;  %176 = vst [vmem:[%s159_s29] sm:$0xff] (%p93_p3), %v175_v0  ;;  %178 = vst [vmem:[%s159_s29 + $0x8] sm:$0xff] (%p93_p3), %v177_v1  ;;  %v181_v3 = vld [vmem:[%s759_s28 + $0x28] sm:$0xff] (%p93_p3) }
  0x13   : > { %180 = vst [vmem:[%s159_s29 + $0x10] sm:$0xff] (%p93_p3), %v179_v2  ;;  %v183_v4 = vld [vmem:[%s759_s28 + $0x40] sm:$0xff] (%p93_p3)  ;;  %v185_v5 = vld [vmem:[%s759_s28 + $0x48] sm:$0xff] (%p93_p3)  ;;  %182 = vst [vmem:[%s159_s29 + $0x18] sm:$0xff] (%p93_p3), %v181_v3 }
  0x14   : > { %184 = vst [vmem:[%s159_s29 + $0x20] sm:$0xff] (%p93_p3), %v183_v4  ;;  %186 = vst [vmem:[%s159_s29 + $0x28] sm:$0xff] (%p93_p3), %v185_v5  ;;  %v187_v6 = vld [vmem:[%s759_s28 + $0x60] sm:$0xff] (%p93_p3)  ;;  %v189_v7 = vld [vmem:[%s759_s28 + $0x68] sm:$0xff] (%p93_p3) }
  0x15   : > { %v191_v8 = vld [vmem:[%s759_s28 + $0x80] sm:$0xff]  ;;  %188 = vst [vmem:[%s159_s29 + $0x30] sm:$0xff] %v187_v6  ;;  %190 = vst [vmem:[%s159_s29 + $0x38] sm:$0xff] %v189_v7  ;;  %v193_v9 = vld [vmem:[%s759_s28 + $0x88] sm:$0xff] }
  0x16   : > { %192 = vst [vmem:[%s159_s29 + $0x40] sm:$0xff] %v191_v8  ;;  %v195_v10 = vld [vmem:[%s759_s28 + $0xa0] sm:$0xff]  ;;  %v197_v11 = vld [vmem:[%s759_s28 + $0xa8] sm:$0xff]  ;;  %194 = vst [vmem:[%s159_s29 + $0x48] sm:$0xff] %v193_v9 }
  0x17   : > { %196 = vst [vmem:[%s159_s29 + $0x50] sm:$0xff] %v195_v10  ;;  %198 = vst [vmem:[%s159_s29 + $0x58] sm:$0xff] %v197_v11  ;;  %v199_v12 = vld [vmem:[%s759_s28 + $0xc0] sm:$0xff]  ;;  %v201_v13 = vld [vmem:[%s759_s28 + $0xc8] sm:$0xff] }
  0x18   : > { %v203_v14 = vld [vmem:[%s759_s28 + $0xe0] sm:$0xff]  ;;  %200 = vst [vmem:[%s159_s29 + $0x60] sm:$0xff] %v199_v12  ;;  %202 = vst [vmem:[%s159_s29 + $0x68] sm:$0xff] %v201_v13  ;;  %v205_v15 = vld [vmem:[%s759_s28 + $0xe8] sm:$0xff] }
  0x19   : > { %204 = vst [vmem:[%s159_s29 + $0x70] sm:$0xff] %v203_v14  ;;  %206 = vst [vmem:[%s159_s29 + $0x78] sm:$0xff] %v205_v15 }
  0x1a PF: > { %p581_p5 = scmp.ge.s32.totalorder %s697_s17, 1  ;;  %p211_p6 = scmp.lt.s32.totalorder %s697_s17, 3 }
  0x1c   : > { %p212_p7 = pnand %p581_p5, %p211_p6 }
  0x1d   : > { %s218_s30 = sand.u32 (!%p212_p7), 1, %s689_s15   ;;  %v699_v16 = vmov (!%p212_p7), 0   ;;  %v445_v17 = vld [vmem:[%s829_s1 + $0x8] sm:$0xff] (!%p212_p7)  ;;  %v444_v18 = vld [vmem:[%s829_s1] sm:$0xff] (!%p212_p7)  ;;  %vm354_vm0 = vcmask (!%p212_p7), 523264   ;;  %s583_s21 = sshll.u32 (!%p212_p7), %s574_s18, 2 }
  0x1e   : > { %215 = sbr.rel (%p212_p7) target bundleno = 301 (0x12d), region = 55  ;;  %s582_s5 = sshll.u32 (!%p212_p7), %s218_s30, 7  ;;  %390 = vmatprep.mubr.bf16.mxu0 (!%p212_p7), %v699_v16  ;;  %433 = vmatprep.mubr.bf16.mxu1 (!%p212_p7), %v699_v16  ;;  %v465_v20 = vld [vmem:[%s830_s2 + $0x8] sm:$0xff] (!%p212_p7)  ;;  %v464_v22 = vld [vmem:[%s830_s2] sm:$0xff] (!%p212_p7) }
  0x1f   : > { %632 = vset.pattern.permute.xlu0 (!%p212_p7), %v699_v16  ;;  %633 = vset.pattern.permute.xlu1 (!%p212_p7), %v699_v16  ;;  %s786_s10 = scalar_lea.vmem (!%p212_p7), [#allocation2], %s582_s5  ;;  %v658_v37 = vld [vmem:[%s828_s0] sm:$0xff] (!%p212_p7)   ;;  %p245_p8 = scmp.lt.s32.totalorder (!%p212_p7), %s583_s21, 7 }
  0x20   : > { %v634_v19 = vld [vmem:[%s786_s10 + $0x4] ss:$16 sps:$4 sm:$0xff] (!%p212_p7)   ;;  %453 = vperm.xlu0 (!%p212_p7), %632, %v445_v17   ;;  %448 = vperm.xlu1 (!%p212_p7), %633, %v444_v18   ;;  %v636_v21 = vld [vmem:[%s786_s10 + $0xc] ss:$16 sps:$4 sm:$0xff] (!%p212_p7)   ;;  %v638_v23 = vld [vmem:[%s786_s10] ss:$16 sps:$4 sm:$0xff] (!%p212_p7)  }
  0x21   : > { %358 = vmatprep.subr.bf16.mxu0 (!%p212_p7), %v634_v19  ;;  %v639_v24 = vld [vmem:[%s786_s10 + $0x8] ss:$16 sps:$4 sm:$0xff] (!%p212_p7)   ;;  %401 = vmatprep.subr.bf16.mxu1 (!%p212_p7), %v636_v21  ;;  %v640_v25 = vld [vmem:[%s786_s10 + $0x24] ss:$16 sps:$4 sm:$0xff] (!%p212_p7)   ;;  %v642_v26 = vld [vmem:[%s786_s10 + $0x2c] ss:$16 sps:$4 sm:$0xff] (!%p212_p7)  }
  0x22   : > { %359 = vmatpush1.bf16.msra.mxu0 (!%p212_p7), %v638_v23  ;;  %402 = vmatpush1.bf16.msra.mxu1 (!%p212_p7), %v639_v24  ;;  %v644_v27 = vld [vmem:[%s786_s10 + $0x20] ss:$16 sps:$4 sm:$0xff] (!%p212_p7)   ;;  %v645_v28 = vld [vmem:[%s786_s10 + $0x28] ss:$16 sps:$4 sm:$0xff] (!%p212_p7)   ;;  %v646_v29 = vld [vmem:[%s786_s10 + $0x44] ss:$16 sps:$4 sm:$0xff] (!%p212_p7)  }
  0x23   : > { %360 = vmatprep.subr.bf16.mxu0 (!%p212_p7), %v640_v25  ;;  %403 = vmatprep.subr.bf16.mxu1 (!%p212_p7), %v642_v26  ;;  %v648_v30 = vld [vmem:[%s786_s10 + $0x4c] ss:$16 sps:$4 sm:$0xff] (!%p212_p7)   ;;  %v650_v31 = vld [vmem:[%s786_s10 + $0x40] ss:$16 sps:$4 sm:$0xff] (!%p212_p7)   ;;  %v651_v32 = vld [vmem:[%s786_s10 + $0x48] ss:$16 sps:$4 sm:$0xff] (!%p212_p7)  }
  0x24   : > { %473 = vperm.xlu0 (!%p212_p7), %632, %v465_v20   ;;  %468 = vperm.xlu1 (!%p212_p7), %633, %v464_v22   ;;  %v652_v33 = vld [vmem:[%s786_s10 + $0x64] ss:$16 sps:$4 sm:$0xff] (!%p212_p7)   ;;  %v654_v34 = vld [vmem:[%s786_s10 + $0x6c] ss:$16 sps:$4 sm:$0xff] (!%p212_p7)   ;;  %v656_v35 = vld [vmem:[%s786_s10 + $0x60] ss:$16 sps:$4 sm:$0xff] (!%p212_p7)  }
  0x25   : > { %v657_v36 = vld [vmem:[%s786_s10 + $0x68] ss:$16 sps:$4 sm:$0xff]   ;;  %s837_s21 = smov (!%p245_p8, %s583_s21), 7 }
  0x26   : > { %361 = vmatpush1.bf16.msra.mxu0 %v644_v27  ;;  %404 = vmatpush1.bf16.msra.mxu1 %v645_v28  ;;  %s584_s17 = sshll.u32 %s837_s21, 3 }
  0x27   : > { %362 = vmatprep.subr.bf16.mxu0 %v646_v29  ;;  %405 = vmatprep.subr.bf16.mxu1 %v648_v30  ;;  %s248_s24 = scalar_lea.vmem %s832_s4, %s584_s17 }
  0x2a   : > { %363 = vmatpush1.bf16.msra.mxu0 %v650_v31  ;;  %406 = vmatpush1.bf16.msra.mxu1 %v651_v32 }
  0x2b   : > { %364 = vmatprep.subr.bf16.mxu0 %v652_v33  ;;  %407 = vmatprep.subr.bf16.mxu1 %v654_v34 }
  0x2e   : > { %365 = vmatpush1.bf16.msra.mxu0 %v656_v35  ;;  %408 = vmatpush1.bf16.msra.mxu1 %v657_v36 }
  0x31   : > { %602 = vmatmul.mubr.msk.bf16.vlgmr.msra.gmra.mrb[0].mxu0 %vm354_vm0, %v658_v37  ;;  %603 = vmatmul.mubr.msk.bf16.vlgmr.msra.gmra.mrb[0].mxu1 %vm354_vm0, %v658_v37 }
  0x9f   : > { %v454_v38 = vpop.permute.xlu0 %453  ;;  %v449_v6 = vpop.permute.xlu1 %448 }
  0xa3   : > { %v474_v49 = vpop.permute.xlu0 %473  ;;  %v469_v11 = vpop.permute.xlu1 %468 }
 0x104   : > { %v392_v39 = vpop.f32.mrb[0].mxu0  ;;  %v435_v40 = vpop.f32.mrb[0].mxu1 }
 0x105   : > { %v394_v41 = vpop.f32.mrb[1].mxu0  ;;  %v437_v42 = vpop.f32.mrb[1].mxu1  ;;  %v456_v9 = vmul.f32 %v449_v6, %v392_v39  ;;  %v458_v10 = vmul.f32 %v449_v6, %v435_v40 }
 0x106   : > { %v396_v43 = vpop.f32.mrb[2].mxu0  ;;  %v439_v44 = vpop.f32.mrb[2].mxu1  ;;  %v457_v12 = vmul.f32 %v449_v6, %v394_v41  ;;  %v459_v13 = vmul.f32 %v449_v6, %v437_v42 }
 0x107   : > { %v460_v45 = vmul.f32 %v454_v38, %v396_v43  ;;  %v462_v46 = vmul.f32 %v454_v38, %v439_v44  ;;  %v398_v47 = vpop.f32.mrb[3].mxu0  ;;  %v441_v48 = vpop.f32.mrb[3].mxu1  ;;  %v476_v14 = vadd.f32 %v469_v11, %v456_v9  ;;  %v478_v16 = vadd.f32 %v469_v11, %v458_v10 }
 0x108   : > { %v461_v50 = vmul.f32 %v454_v38, %v398_v47  ;;  %v463_v51 = vmul.f32 %v454_v38, %v441_v48  ;;  %v477_v18 = vadd.f32 %v469_v11, %v457_v12  ;;  %v479_v21 = vadd.f32 %v469_v11, %v459_v13 }
 0x109   : > { %v480_v52 = vadd.f32 %v474_v49, %v460_v45  ;;  %v482_v53 = vadd.f32 %v474_v49, %v462_v46 }
 0x10a   : > { %v481_v54 = vadd.f32 %v474_v49, %v461_v50  ;;  %v483_v55 = vadd.f32 %v474_v49, %v463_v51 }
 0x10b   : > { %v484_v56 = vsub.f32 0.0, %v480_v52  ;;  %v486_v57 = vsub.f32 0.0, %v482_v53 }
 0x10c   : > { %v485_v58 = vsub.f32 0.0, %v481_v54  ;;  %v487_v59 = vsub.f32 0.0, %v483_v55 }
 0x10d   : > { %v488_v60 = vmul.f32 1.442695, %v484_v56  ;;  %v492_v61 = vmul.f32 1.442695, %v486_v57 }
 0x10e   : > { %v490_v62 = vmul.f32 1.442695, %v485_v58  ;;  %v494_v63 = vmul.f32 1.442695, %v487_v59 }
 0x10f   : > { %659 = vpow2.f32 %v488_v60 }
 0x110   : > { %661 = vpow2.f32 %v492_v61 }
 0x111   : > { %663 = vpow2.f32 %v490_v62 }
 0x112   : > { %665 = vpow2.f32 %v494_v63 }
 0x119   : > { %v660_v0 = vpop.eup %659 }
 0x11a   : > { %v662_v1 = vpop.eup %661  ;;  %v496_v2 = vadd.f32 1.0, %v660_v0 }
 0x11b   : > { %v664_v3 = vpop.eup %663  ;;  %v498_v4 = vadd.f32 1.0, %v662_v1 }
 0x11c   : > { %v666_v5 = vpop.eup %665  ;;  %667 = vrcp.f32 %v496_v2  ;;  %v497_v7 = vadd.f32 1.0, %v664_v3 }
 0x11d   : > { %669 = vrcp.f32 %v498_v4  ;;  %v499_v8 = vadd.f32 1.0, %v666_v5 }
 0x11e   : > { %671 = vrcp.f32 %v497_v7 }
 0x11f   : > { %673 = vrcp.f32 %v499_v8 }
 0x126   : > { %v668_v15 = vpop.eup %667 }
 0x127   : > { %v670_v17 = vpop.eup %669  ;;  %v504_v19 = vmul.f32 %v668_v15, %v476_v14 }
 0x128   : > { %v672_v20 = vpop.eup %671  ;;  %v506_v22 = vmul.f32 %v670_v17, %v478_v16 }
 0x129   : > { %v674_v23 = vpop.eup %673  ;;  %508 = vst [vmem:[%s248_s24] sm:$0xff] %v504_v19  ;;  %v505_v24 = vmul.f32 %v672_v20, %v477_v18 }
 0x12a   : > { %v507_v25 = vmul.f32 %v674_v23, %v479_v21  ;;  %510 = vst [vmem:[%s248_s24 + $0x10] sm:$0xff] %v506_v22 }
 0x12b   : > { %509 = vst [vmem:[%s248_s24 + $0x8] sm:$0xff] %v505_v24 }
 0x12c   : > { %511 = vst [vmem:[%s248_s24 + $0x18] sm:$0xff] %v507_v25 }
 0x12d PF: > { %p11_p9 = scmp.ge.s32.totalorder %s742_s19, 4   ;;  %s833_s15 = smov %s693_s16 }
 0x12e   : > { %s834_s16 = smov %s751_s22  ;;  %s835_s17 = smov %s742_s19 }
 0x12f   :  { %13 = sbr.rel (!%p11_p9) target bundleno = 2 (0x2), region = 94 }

</bundles_post_ra>
